<compile_context>
chip_gen: v5e
topology: v5e:2x2
jax: 0.10.0
libtpu: 0.0.40
codegen_flags: <defaults>
</compile_context>

<pallas_src>
from functools import partial

import jax
import jax.numpy as jnp
from jax.experimental import pallas as pl
from jax.experimental.pallas import tpu as pltpu


def _doc_encoder_kernel(
    brand_ids_ref,   # [Bp] int32, SMEM (scalar prefetch)
    color_ids_ref,   # [Bp] int32, SMEM (scalar prefetch)
    doc_ref,         # [TB, H]  document embedding tile
    w_doc_ref,       # [H, O]   fc weight block for doc features (resident)
    brand_proj_ref,  # [Vb, O]  brand_table @ W_brand + bias     (resident)
    color_proj_ref,  # [Vc, O]  color_table @ W_color            (resident)
    out_ref,         # [TB, O]
    emb_ref,         # [TB, O]  f32 VMEM scratch (gathered fused embeddings)
):
    tb = out_ref.shape[0]
    base = pl.program_id(0) * tb

    # Gather the fused (pre-projected) brand/color rows for this batch tile.
    def gather_row(i, carry):
        b = brand_ids_ref[base + i]
        c = color_ids_ref[base + i]
        emb_ref[pl.ds(i, 1), :] = (brand_proj_ref[pl.ds(b, 1), :]
                                   + color_proj_ref[pl.ds(c, 1), :])
        return carry

    jax.lax.fori_loop(0, tb, gather_row, 0,
                      unroll=True if tb <= 16 else 8)

    # Single lane-dense MXU matmul for the doc-feature block of the Linear.
    acc = jnp.dot(doc_ref[...].astype(w_doc_ref.dtype), w_doc_ref[...],
                  preferred_element_type=jnp.float32)
    out_ref[...] = (acc + emb_ref[...]).astype(out_ref.dtype)


def prepare_document_encoder_params(brand_table, color_table,
                                    fc_weight, fc_bias,
                                    param_dtype=jnp.float32):
    """One-time weight prep — NOT in the per-call hot path.

    Splits the nn.Linear weight along its input dim and folds the tiny
    brand/color embedding matmuls into precomputed projection tables.
    Set param_dtype=jnp.bfloat16 to halve weight HBM traffic (f32 accumulation
    is kept inside the kernel via preferred_element_type).
    """
    Vb, Db = brand_table.shape
    Vc, Dc = color_table.shape
    O, in_dim = fc_weight.shape
    H = in_dim - Db - Dc
    hp = jax.lax.Precision.HIGHEST

    w_t = fc_weight.T                    # [H+Db+Dc, O] — transposed ONCE here
    w_doc = w_t[:H]                      # [H,  O]
    w_brand = w_t[H:H + Db]              # [Db, O]
    w_color = w_t[H + Db:]               # [Dc, O]

    # Exactly one brand row is gathered per example -> folding bias is exact.
    brand_proj = jnp.dot(brand_table, w_brand, precision=hp) + fc_bias[None, :]
    color_proj = jnp.dot(color_table, w_color, precision=hp)

    return {
        "w_doc": w_doc.astype(param_dtype),
        "brand_proj": brand_proj.astype(jnp.float32),
        "color_proj": color_proj.astype(jnp.float32),
    }


@partial(jax.jit, static_argnames=("block_b",))
def document_encoder_forward(doc_emb, brand_ids, color_ids, params, *,
                             block_b=256):
    """doc_emb: [B, H] f32, brand_ids/color_ids: [B] int,
    params: output of prepare_document_encoder_params. Returns [B, O] f32."""
    B, H = doc_emb.shape
    w_doc = params["w_doc"]
    brand_proj = params["brand_proj"]
    color_proj = params["color_proj"]
    Vb, O = brand_proj.shape
    Vc = color_proj.shape[0]

    def round_up(x, m):
        return (x + m - 1) // m * m

    # Batch tile: multiple of 8 sublanes; 256-row tiles for realistic batches.
    TB = block_b if B >= block_b else round_up(B, 8)
    Bp = round_up(B, TB)
    if Bp != B:
        doc_emb = jnp.pad(doc_emb, ((0, Bp - B), (0, 0)))
        brand_ids = jnp.pad(brand_ids, (0, Bp - B))   # 0 == padding_idx
        color_ids = jnp.pad(color_ids, (0, Bp - B))
    brand_ids = brand_ids.astype(jnp.int32)
    color_ids = color_ids.astype(jnp.int32)

    grid_spec = pltpu.PrefetchScalarGridSpec(
        num_scalar_prefetch=2,
        grid=(Bp // TB,),
        in_specs=[
            # doc tiles stream with the grid ...
            pl.BlockSpec((TB, H), lambda i, bids, cids: (i, 0)),
            # ... weights / fused tables are grid-invariant (DMA'd once).
            pl.BlockSpec((H, O), lambda i, bids, cids: (0, 0)),
            pl.BlockSpec((Vb, O), lambda i, bids, cids: (0, 0)),
            pl.BlockSpec((Vc, O), lambda i, bids, cids: (0, 0)),
        ],
        out_specs=pl.BlockSpec((TB, O), lambda i, bids, cids: (i, 0)),
        scratch_shapes=[pltpu.VMEM((TB, O), jnp.float32)],
    )

    out = pl.pallas_call(
        _doc_encoder_kernel,
        out_shape=jax.ShapeDtypeStruct((Bp, O), jnp.float32),
        grid_spec=grid_spec,
        compiler_params=pltpu.CompilerParams(
            dimension_semantics=("parallel",)),   # shards tiles across TCs (v7x)
    )(brand_ids, color_ids, doc_emb, w_doc, brand_proj, color_proj)

    return out[:B] if Bp != B else out


if __name__ == "__main__":
    # Small shapes consistent with the module's forward.
    B = 8              # batch of documents
    H = 32             # model.config.hidden_size (small synthetic)
    Db = Dc = 16       # brand_embedding_dim / color_embedding_dim
    Vb, Vc = 10, 12    # len(brand_encoder) / len(color_encoder)
    O = 384            # output_dim

    key = jax.random.PRNGKey(0)
    k_doc, k_bt, k_ct, k_w, k_b, k_bi, k_ci = jax.random.split(key, 7)

    # Synthetic CLS document embeddings (stand-in for transformer output).
    doc_emb = jax.random.normal(k_doc, (B, H), dtype=jnp.float32)

    # Embedding tables (padding_idx=0 row zeroed, as nn.Embedding does).
    brand_table = jax.random.normal(k_bt, (Vb, Db), dtype=jnp.float32)
    brand_table = brand_table.at[0].set(0.0)
    color_table = jax.random.normal(k_ct, (Vc, Dc), dtype=jnp.float32)
    color_table = color_table.at[0].set(0.0)

    # nn.Linear(H+Db+Dc, O): weight [O, in], bias [O].
    in_dim = H + Db + Dc
    bound = 1.0 / jnp.sqrt(jnp.float32(in_dim))
    fc_weight = jax.random.uniform(k_w, (O, in_dim), dtype=jnp.float32,
                                   minval=-bound, maxval=bound)
    fc_bias = jax.random.uniform(k_b, (O,), dtype=jnp.float32,
                                 minval=-bound, maxval=bound)

    # Integer ids produced by the label encoders (0 = padding / unknown).
    brand_ids = jax.random.randint(k_bi, (B,), 0, Vb, dtype=jnp.int32)
    color_ids = jax.random.randint(k_ci, (B,), 0, Vc, dtype=jnp.int32)

    # One-time weight prep (keep f32 here so the check is exact; pass
    # param_dtype=jnp.bfloat16 for bandwidth-bound production serving).
    params = prepare_document_encoder_params(brand_table, color_table,
                                             fc_weight, fc_bias,
                                             param_dtype=jnp.float32)

    out = document_encoder_forward(doc_emb, brand_ids, color_ids, params)
    out = jax.block_until_ready(out)

    # Pure-JAX reference (exactly mirrors the PyTorch forward semantics).
    combined = jnp.concatenate(
        [doc_emb, brand_table[brand_ids], color_table[color_ids]], axis=1)
    ref = jnp.dot(combined, fc_weight.T,
                  precision=jax.lax.Precision.HIGHEST) + fc_bias

    assert out.shape == (B, O) and out.dtype == jnp.float32
    assert jnp.allclose(out, ref, atol=1e-4, rtol=1e-4), "mismatch vs reference"
    print("KERNEL_OK")
</pallas_src>

<mosaic_0001>
module attributes {stable_mosaic.version = 11 : i64} {
  func.func @_doc_encoder_kernel(%arg0: i32, %arg1: memref<8xi32, #tpu.memory_space<smem>>, %arg2: memref<8xi32, #tpu.memory_space<smem>>, %arg3: memref<8x32xf32, #tpu.memory_space<vmem>>, %arg4: memref<32x384xf32, #tpu.memory_space<vmem>>, %arg5: memref<10x384xf32, #tpu.memory_space<vmem>>, %arg6: memref<12x384xf32, #tpu.memory_space<vmem>>, %arg7: memref<8x384xf32, #tpu.memory_space<vmem>>, %arg8: memref<8x384xf32, #tpu.memory_space<vmem>>) attributes {dimension_semantics = [#tpu.dimension_semantics<parallel>], iteration_bounds = array<i64: 1>, scalar_prefetch = 2 : i64, scratch_operands = 1 : i64, tpu.core_type = #tpu.core_type<tc>, window_params = [{transform_indices = @transform_0, window_bounds = array<i64: 8, 32>}, {pipeline_mode = #tpu.pipeline_mode<synchronous>, transform_indices = @transform_1, window_bounds = array<i64: 32, 384>}, {pipeline_mode = #tpu.pipeline_mode<synchronous>, transform_indices = @transform_2, window_bounds = array<i64: 10, 384>}, {pipeline_mode = #tpu.pipeline_mode<synchronous>, transform_indices = @transform_3, window_bounds = array<i64: 12, 384>}, {transform_indices = @transform_4, window_bounds = array<i64: 8, 384>}]} {
    %c8_i32 = arith.constant 8 : i32
    %0 = arith.muli %arg0, %c8_i32 : i32
    %c0_i32 = arith.constant 0 : i32
    %1 = arith.addi %0, %c0_i32 : i32
    %2 = arith.index_cast %1 : i32 to index
    %3 = memref.load %arg1[%2] : memref<8xi32, #tpu.memory_space<smem>>
    %4 = arith.addi %0, %c0_i32 : i32
    %5 = arith.index_cast %4 : i32 to index
    %6 = memref.load %arg2[%5] : memref<8xi32, #tpu.memory_space<smem>>
    %7 = arith.index_cast %3 : i32 to index
    %c0 = arith.constant 0 : index
    %8 = vector.load %arg5[%7, %c0] : memref<10x384xf32, #tpu.memory_space<vmem>>, vector<1x384xf32>
    %9 = arith.index_cast %6 : i32 to index
    %c0_0 = arith.constant 0 : index
    %10 = vector.load %arg6[%9, %c0_0] : memref<12x384xf32, #tpu.memory_space<vmem>>, vector<1x384xf32>
    %11 = arith.addf %8, %10 : vector<1x384xf32>
    %12 = arith.index_cast %c0_i32 : i32 to index
    %c0_1 = arith.constant 0 : index
    %13 = vector.load %arg8[%12, %c0_1] : memref<8x384xf32, #tpu.memory_space<vmem>>, vector<1x384xf32>
    tpu.vector_store %arg8[%12, %c0_1], %11 {strides = array<i32>} : memref<8x384xf32, #tpu.memory_space<vmem>>, vector<1x384xf32>,
    %c1_i32 = arith.constant 1 : i32
    %14 = arith.addi %0, %c1_i32 : i32
    %15 = arith.index_cast %14 : i32 to index
    %16 = memref.load %arg1[%15] : memref<8xi32, #tpu.memory_space<smem>>
    %17 = arith.addi %0, %c1_i32 : i32
    %18 = arith.index_cast %17 : i32 to index
    %19 = memref.load %arg2[%18] : memref<8xi32, #tpu.memory_space<smem>>
    %20 = arith.index_cast %16 : i32 to index
    %c0_2 = arith.constant 0 : index
    %21 = vector.load %arg5[%20, %c0_2] : memref<10x384xf32, #tpu.memory_space<vmem>>, vector<1x384xf32>
    %22 = arith.index_cast %19 : i32 to index
    %c0_3 = arith.constant 0 : index
    %23 = vector.load %arg6[%22, %c0_3] : memref<12x384xf32, #tpu.memory_space<vmem>>, vector<1x384xf32>
    %24 = arith.addf %21, %23 : vector<1x384xf32>
    %25 = arith.index_cast %c1_i32 : i32 to index
    %c0_4 = arith.constant 0 : index
    %26 = vector.load %arg8[%25, %c0_4] : memref<8x384xf32, #tpu.memory_space<vmem>>, vector<1x384xf32>
    tpu.vector_store %arg8[%25, %c0_4], %24 {strides = array<i32>} : memref<8x384xf32, #tpu.memory_space<vmem>>, vector<1x384xf32>,
    %c2_i32 = arith.constant 2 : i32
    %27 = arith.addi %0, %c2_i32 : i32
    %28 = arith.index_cast %27 : i32 to index
    %29 = memref.load %arg1[%28] : memref<8xi32, #tpu.memory_space<smem>>
    %30 = arith.addi %0, %c2_i32 : i32
    %31 = arith.index_cast %30 : i32 to index
    %32 = memref.load %arg2[%31] : memref<8xi32, #tpu.memory_space<smem>>
    %33 = arith.index_cast %29 : i32 to index
    %c0_5 = arith.constant 0 : index
    %34 = vector.load %arg5[%33, %c0_5] : memref<10x384xf32, #tpu.memory_space<vmem>>, vector<1x384xf32>
    %35 = arith.index_cast %32 : i32 to index
    %c0_6 = arith.constant 0 : index
    %36 = vector.load %arg6[%35, %c0_6] : memref<12x384xf32, #tpu.memory_space<vmem>>, vector<1x384xf32>
    %37 = arith.addf %34, %36 : vector<1x384xf32>
    %38 = arith.index_cast %c2_i32 : i32 to index
    %c0_7 = arith.constant 0 : index
    %39 = vector.load %arg8[%38, %c0_7] : memref<8x384xf32, #tpu.memory_space<vmem>>, vector<1x384xf32>
    tpu.vector_store %arg8[%38, %c0_7], %37 {strides = array<i32>} : memref<8x384xf32, #tpu.memory_space<vmem>>, vector<1x384xf32>,
    %c3_i32 = arith.constant 3 : i32
    %40 = arith.addi %0, %c3_i32 : i32
    %41 = arith.index_cast %40 : i32 to index
    %42 = memref.load %arg1[%41] : memref<8xi32, #tpu.memory_space<smem>>
    %43 = arith.addi %0, %c3_i32 : i32
    %44 = arith.index_cast %43 : i32 to index
    %45 = memref.load %arg2[%44] : memref<8xi32, #tpu.memory_space<smem>>
    %46 = arith.index_cast %42 : i32 to index
    %c0_8 = arith.constant 0 : index
    %47 = vector.load %arg5[%46, %c0_8] : memref<10x384xf32, #tpu.memory_space<vmem>>, vector<1x384xf32>
    %48 = arith.index_cast %45 : i32 to index
    %c0_9 = arith.constant 0 : index
    %49 = vector.load %arg6[%48, %c0_9] : memref<12x384xf32, #tpu.memory_space<vmem>>, vector<1x384xf32>
    %50 = arith.addf %47, %49 : vector<1x384xf32>
    %51 = arith.index_cast %c3_i32 : i32 to index
    %c0_10 = arith.constant 0 : index
    %52 = vector.load %arg8[%51, %c0_10] : memref<8x384xf32, #tpu.memory_space<vmem>>, vector<1x384xf32>
    tpu.vector_store %arg8[%51, %c0_10], %50 {strides = array<i32>} : memref<8x384xf32, #tpu.memory_space<vmem>>, vector<1x384xf32>,
    %c4_i32 = arith.constant 4 : i32
    %53 = arith.addi %0, %c4_i32 : i32
    %54 = arith.index_cast %53 : i32 to index
    %55 = memref.load %arg1[%54] : memref<8xi32, #tpu.memory_space<smem>>
    %56 = arith.addi %0, %c4_i32 : i32
    %57 = arith.index_cast %56 : i32 to index
    %58 = memref.load %arg2[%57] : memref<8xi32, #tpu.memory_space<smem>>
    %59 = arith.index_cast %55 : i32 to index
    %c0_11 = arith.constant 0 : index
    %60 = vector.load %arg5[%59, %c0_11] : memref<10x384xf32, #tpu.memory_space<vmem>>, vector<1x384xf32>
    %61 = arith.index_cast %58 : i32 to index
    %c0_12 = arith.constant 0 : index
    %62 = vector.load %arg6[%61, %c0_12] : memref<12x384xf32, #tpu.memory_space<vmem>>, vector<1x384xf32>
    %63 = arith.addf %60, %62 : vector<1x384xf32>
    %64 = arith.index_cast %c4_i32 : i32 to index
    %c0_13 = arith.constant 0 : index
    %65 = vector.load %arg8[%64, %c0_13] : memref<8x384xf32, #tpu.memory_space<vmem>>, vector<1x384xf32>
    tpu.vector_store %arg8[%64, %c0_13], %63 {strides = array<i32>} : memref<8x384xf32, #tpu.memory_space<vmem>>, vector<1x384xf32>,
    %c5_i32 = arith.constant 5 : i32
    %66 = arith.addi %0, %c5_i32 : i32
    %67 = arith.index_cast %66 : i32 to index
    %68 = memref.load %arg1[%67] : memref<8xi32, #tpu.memory_space<smem>>
    %69 = arith.addi %0, %c5_i32 : i32
    %70 = arith.index_cast %69 : i32 to index
    %71 = memref.load %arg2[%70] : memref<8xi32, #tpu.memory_space<smem>>
    %72 = arith.index_cast %68 : i32 to index
    %c0_14 = arith.constant 0 : index
    %73 = vector.load %arg5[%72, %c0_14] : memref<10x384xf32, #tpu.memory_space<vmem>>, vector<1x384xf32>
    %74 = arith.index_cast %71 : i32 to index
    %c0_15 = arith.constant 0 : index
    %75 = vector.load %arg6[%74, %c0_15] : memref<12x384xf32, #tpu.memory_space<vmem>>, vector<1x384xf32>
    %76 = arith.addf %73, %75 : vector<1x384xf32>
    %77 = arith.index_cast %c5_i32 : i32 to index
    %c0_16 = arith.constant 0 : index
    %78 = vector.load %arg8[%77, %c0_16] : memref<8x384xf32, #tpu.memory_space<vmem>>, vector<1x384xf32>
    tpu.vector_store %arg8[%77, %c0_16], %76 {strides = array<i32>} : memref<8x384xf32, #tpu.memory_space<vmem>>, vector<1x384xf32>,
    %c6_i32 = arith.constant 6 : i32
    %79 = arith.addi %0, %c6_i32 : i32
    %80 = arith.index_cast %79 : i32 to index
    %81 = memref.load %arg1[%80] : memref<8xi32, #tpu.memory_space<smem>>
    %82 = arith.addi %0, %c6_i32 : i32
    %83 = arith.index_cast %82 : i32 to index
    %84 = memref.load %arg2[%83] : memref<8xi32, #tpu.memory_space<smem>>
    %85 = arith.index_cast %81 : i32 to index
    %c0_17 = arith.constant 0 : index
    %86 = vector.load %arg5[%85, %c0_17] : memref<10x384xf32, #tpu.memory_space<vmem>>, vector<1x384xf32>
    %87 = arith.index_cast %84 : i32 to index
    %c0_18 = arith.constant 0 : index
    %88 = vector.load %arg6[%87, %c0_18] : memref<12x384xf32, #tpu.memory_space<vmem>>, vector<1x384xf32>
    %89 = arith.addf %86, %88 : vector<1x384xf32>
    %90 = arith.index_cast %c6_i32 : i32 to index
    %c0_19 = arith.constant 0 : index
    %91 = vector.load %arg8[%90, %c0_19] : memref<8x384xf32, #tpu.memory_space<vmem>>, vector<1x384xf32>
    tpu.vector_store %arg8[%90, %c0_19], %89 {strides = array<i32>} : memref<8x384xf32, #tpu.memory_space<vmem>>, vector<1x384xf32>,
    %c7_i32 = arith.constant 7 : i32
    %92 = arith.addi %0, %c7_i32 : i32
    %93 = arith.index_cast %92 : i32 to index
    %94 = memref.load %arg1[%93] : memref<8xi32, #tpu.memory_space<smem>>
    %95 = arith.addi %0, %c7_i32 : i32
    %96 = arith.index_cast %95 : i32 to index
    %97 = memref.load %arg2[%96] : memref<8xi32, #tpu.memory_space<smem>>
    %98 = arith.index_cast %94 : i32 to index
    %c0_20 = arith.constant 0 : index
    %99 = vector.load %arg5[%98, %c0_20] : memref<10x384xf32, #tpu.memory_space<vmem>>, vector<1x384xf32>
    %100 = arith.index_cast %97 : i32 to index
    %c0_21 = arith.constant 0 : index
    %101 = vector.load %arg6[%100, %c0_21] : memref<12x384xf32, #tpu.memory_space<vmem>>, vector<1x384xf32>
    %102 = arith.addf %99, %101 : vector<1x384xf32>
    %103 = arith.index_cast %c7_i32 : i32 to index
    %c0_22 = arith.constant 0 : index
    %104 = vector.load %arg8[%103, %c0_22] : memref<8x384xf32, #tpu.memory_space<vmem>>, vector<1x384xf32>
    tpu.vector_store %arg8[%103, %c0_22], %102 {strides = array<i32>} : memref<8x384xf32, #tpu.memory_space<vmem>>, vector<1x384xf32>,
    %c8_i32_23 = arith.constant 8 : i32
    %c0_24 = arith.constant 0 : index
    %c0_25 = arith.constant 0 : index
    %105 = vector.load %arg3[%c0_24, %c0_25] : memref<8x32xf32, #tpu.memory_space<vmem>>, vector<8x32xf32>
    %c0_26 = arith.constant 0 : index
    %c0_27 = arith.constant 0 : index
    %106 = vector.load %arg4[%c0_26, %c0_27] : memref<32x384xf32, #tpu.memory_space<vmem>>, vector<32x384xf32>
    %cst = arith.constant dense<0.000000e+00> : vector<8x384xf32>
    %107 = tpu.matmul %105, %106, %cst {dimension_numbers = #tpu.dot_dimension_numbers<[1], [0], [0], [1], [0, 0, 1, 1], [], []>} : vector<8x32xf32>, vector<32x384xf32>, vector<8x384xf32> -> vector<8x384xf32>
    %c0_28 = arith.constant 0 : index
    %c0_29 = arith.constant 0 : index
    %108 = vector.load %arg8[%c0_28, %c0_29] : memref<8x384xf32, #tpu.memory_space<vmem>>, vector<8x384xf32>
    %109 = arith.addf %107, %108 : vector<8x384xf32>
    %c0_30 = arith.constant 0 : index
    %c0_31 = arith.constant 0 : index
    %110 = vector.load %arg7[%c0_30, %c0_31] : memref<8x384xf32, #tpu.memory_space<vmem>>, vector<8x384xf32>
    tpu.vector_store %arg7[%c0_30, %c0_31], %109 {strides = array<i32>} : memref<8x384xf32, #tpu.memory_space<vmem>>, vector<8x384xf32>,
    return
  }
  func.func @transform_0(%arg0: i32, %arg1: memref<8xi32, #tpu.memory_space<smem>>, %arg2: memref<8xi32, #tpu.memory_space<smem>>) -> (i32, i32) {
    %c0_i32 = arith.constant 0 : i32
    %c0_i32_0 = arith.constant 0 : i32
    return %arg0, %c0_i32 : i32, i32
  }
  func.func @transform_1(%arg0: i32, %arg1: memref<8xi32, #tpu.memory_space<smem>>, %arg2: memref<8xi32, #tpu.memory_space<smem>>) -> (i32, i32) {
    %c0_i32 = arith.constant 0 : i32
    %c0_i32_0 = arith.constant 0 : i32
    %c0_i32_1 = arith.constant 0 : i32
    return %c0_i32, %c0_i32_0 : i32, i32
  }
  func.func @transform_2(%arg0: i32, %arg1: memref<8xi32, #tpu.memory_space<smem>>, %arg2: memref<8xi32, #tpu.memory_space<smem>>) -> (i32, i32) {
    %c0_i32 = arith.constant 0 : i32
    %c0_i32_0 = arith.constant 0 : i32
    %c0_i32_1 = arith.constant 0 : i32
    return %c0_i32, %c0_i32_0 : i32, i32
  }
  func.func @transform_3(%arg0: i32, %arg1: memref<8xi32, #tpu.memory_space<smem>>, %arg2: memref<8xi32, #tpu.memory_space<smem>>) -> (i32, i32) {
    %c0_i32 = arith.constant 0 : i32
    %c0_i32_0 = arith.constant 0 : i32
    %c0_i32_1 = arith.constant 0 : i32
    return %c0_i32, %c0_i32_0 : i32, i32
  }
  func.func @transform_4(%arg0: i32, %arg1: memref<8xi32, #tpu.memory_space<smem>>, %arg2: memref<8xi32, #tpu.memory_space<smem>>) -> (i32, i32) {
    %c0_i32 = arith.constant 0 : i32
    %c0_i32_0 = arith.constant 0 : i32
    return %arg0, %c0_i32 : i32, i32
  }
}

</mosaic_0001>

<bundles_post_ra>
// kernel: document_encoder_forward.1
= control target key start
LH: loop header
LB: loop body
LE: loop exit
PB: predicated region body
PF: predicated region fallthrough
CT: control target
= control target key end

     0   :  { %s643_s27 = smov [#allocation4]   ;;  %s644_s28 = smov [#allocation5]   ;;  %s763_s0 = inlined_call_operand.hbm [shape: s32[8], index: 0, kind: input, shape index: {}]   ;;  %s764_s2 = inlined_call_operand.hbm [shape: f32[8,32], index: 2, kind: input, shape index: {}]   ;;  %s765_s3 = inlined_call_operand.hbm [shape: f32[32,384], index: 3, kind: input, shape index: {}]   ;;  %s766_s4 = inlined_call_operand.hbm [shape: f32[10,384], index: 4, kind: input, shape index: {}]   ;;  %s767_s5 = inlined_call_operand.hbm [shape: f32[12,384], index: 5, kind: input, shape index: {}]   ;;  %s768_s6 = inlined_call_operand.hbm [shape: f32[8,384], index: 6, kind: output, shape index: {}]   ;;  %s769_s1 = inlined_call_operand.vmem [shape: s32[8], index: 1, kind: input, shape index: {}]  }
   0x1   :  { %s12_s23 = sshll.u32 %s763_s0, 4  ;;  %s17_s26 = sshll.u32 %s769_s1, 4  ;;  %s13_s23 = int_to_ptr.hbm [resolvable:$true] %s12_s23  ;;  %s18_s26 = int_to_ptr.vmem [resolvable:$true] %s17_s26 }
   0x2   :  { %15 = dma.hbm_to_smem %s13_s23, 16, %s643_s27, [#allocation3] }
   0x3   :  { %20 = dma.vmem_to_smem %s18_s26, 16, %s644_s28, [#allocation3] }
   0x4   :  { %633 = dma.done.wait [#allocation3], 32 }
   0x5   :  { %634 = vsyncadd [#allocation3], 4294967264 }
   0x6   :  { %23 = sfence }
   0x7   :  { %24 = vsyncpa [#allocation7], 0 }
   0x8   :  { %25 = vsyncpa [#allocation10], 0 }
   0x9   :  { %26 = vsyncpa [#allocation13], 0  ;;  %s43_s0 = sshll.u32 %s765_s3, 4  ;;  %s44_s0 = int_to_ptr.hbm [resolvable:$true] %s43_s0 }
   0xa   :  { %27 = vsyncpa [#allocation8], 0  ;;  %s645_s7 = smov [#allocation9]   ;;  %s33_s10 = sshll.u32 %s764_s2, 4  ;;  %s34_s10 = int_to_ptr.hbm [resolvable:$true] %s33_s10 }
   0xb   :  { %s45_s1 = sshll.u32 %s645_s7, 4  ;;  %s646_s11 = smov 384   ;;  %s46_s1 = int_to_ptr.vmem [resolvable:$true] %s45_s1 }
   0xc   :  { %s647_s12 = smov 24   ;;  %s648_s13 = smov [#allocation6]  }
   0xd   :  { %51 = dma.hbm_to_vmem [thread:$0]  %s44_s0, 1536, %s46_s1, [#allocation10], %s646_s11, %s646_s11, %s647_s12  }
   0xe   :  { %s35_s14 = sshll.u32 %s648_s13, 4  ;;  %s56_s17 = sshll.u32 %s766_s4, 4  ;;  %s36_s14 = int_to_ptr.vmem [resolvable:$true] %s35_s14  ;;  %s57_s17 = int_to_ptr.hbm [resolvable:$true] %s56_s17 }
   0xf   :  { %38 = dma.hbm_to_vmem [thread:$0]  %s34_s10, 128, %s36_s14, [#allocation7]  }
  0x10   :  { %s69_s19 = sshll.u32 %s767_s5, 4  ;;  %s649_s20 = smov [#allocation11]   ;;  %s70_s19 = int_to_ptr.hbm [resolvable:$true] %s69_s19 }
  0x11   :  { %s58_s21 = sshll.u32 %s649_s20, 4  ;;  %s650_s2 = smov [#allocation12]   ;;  %s59_s21 = int_to_ptr.vmem [resolvable:$true] %s58_s21 }
  0x12   :  { %64 = dma.hbm_to_vmem [thread:$0]  %s57_s17, 768, %s59_s21, [#allocation10], %s646_s11, %s646_s11, %s647_s12  }
  0x13   :  { %s71_s22 = sshll.u32 %s650_s2, 4  ;;  %s72_s22 = int_to_ptr.vmem [resolvable:$true] %s71_s22 }
  0x14   :  { %77 = dma.hbm_to_vmem [thread:$0]  %s70_s19, 768, %s72_s22, [#allocation13], %s646_s11, %s646_s11, %s647_s12  }
  0x15   :  { %635 = dma.done.wait [#allocation7], 128  }
  0x16   :  { %636 = vsyncadd [#allocation7], 4294967168 }
  0x17   :  { %637 = dma.done.wait [#allocation10], 2304  }
  0x18   :  { %638 = vsyncadd [#allocation10], 4294964992 }
  0x19   :  { %639 = dma.done.wait [#allocation13], 768  }
  0x1a   :  { %640 = vsyncadd [#allocation13], 4294966528  ;;  %s95_s4 = sld [smem:[#allocation4]]  ;;  %v309_v0 = vld [vmem:[#allocation9 + $0x58] sm:$0xff]  ;;  %v306_v1 = vld [vmem:[#allocation9 + $0x40] sm:$0xff]  ;;  %v116_v2 = vlaneseq  ;;  %vm313_vm0 = vcmask 261120  }
  0x1b   :  { %s705_s23 = sld [smem:[#allocation5]]  ;;  %369 = vmatpush.msra.mxu2 %v309_v0  ;;  %v307_v3 = vld [vmem:[#allocation9 + $0x48] sm:$0xff]  ;;  %v308_v4 = vld [vmem:[#allocation9 + $0x50] sm:$0xff]  ;;  %v305_v7 = vld [vmem:[#allocation9 + $0x38] sm:$0xff] }
  0x1c   :  { %s707_s5 = sld [smem:[#allocation4 + $0x1]]  ;;  %v303_v5 = vld [vmem:[#allocation9 + $0x28] sm:$0xff]  ;;  %329 = vmatpush.msra.mxu0 %v307_v3  ;;  %349 = vmatpush.msra.mxu1 %v308_v4  ;;  %v304_v6 = vld [vmem:[#allocation9 + $0x30] sm:$0xff]  ;;  %v301_v8 = vld [vmem:[#allocation9 + $0x18] sm:$0xff]  ;;  %vm718_vm1 = vcmp.lt.s32.totalorder %v116_v2, 384 }
  0x1d   :  { %s709_s24 = sld [smem:[#allocation5 + $0x1]]  ;;  %370 = vmatpush.msra.mxu2 %v306_v1  ;;  %v302_v9 = vld [vmem:[#allocation9 + $0x20] sm:$0xff]  ;;  %v300_v10 = vld [vmem:[#allocation9 + $0x10] sm:$0xff]  ;;  %v297_v11 = vld [vmem:[#allocation6] sm:$0xff] }
  0x1e   :  { %s711_s25 = sld [smem:[#allocation4 + $0x2]]  ;;  %330 = vmatpush.msra.mxu0 %v304_v6  ;;  %350 = vmatpush.msra.mxu1 %v305_v7  ;;  %v298_v13 = vld [vmem:[#allocation9] sm:$0xff]  ;;  %v299_v15 = vld [vmem:[#allocation9 + $0x8] sm:$0xff] }
  0x1f   :  { %s713_s26 = sld [smem:[#allocation5 + $0x2]]  ;;  %371 = vmatpush.msra.mxu2 %v303_v5 }
  0x20   :  { %s97_s27 = sshra.s32 %s95_s4, 3  ;;  %s100_s28 = sand.u32 7, %s95_s4  ;;  %331 = vmatpush.msra.mxu0 %v301_v8  ;;  %351 = vmatpush.msra.mxu1 %v302_v9 }
  0x21   :  { %s447_s29 = smul.u32 24, %s97_s27  ;;  %s106_s30 = sshra.s32 %s705_s23, 3  ;;  %372 = vmatpush.msra.mxu2 %v300_v10 }
  0x22   :  { %s109_s0 = sand.u32 7, %s705_s23  ;;  %s448_s7 = smul.u32 24, %s106_s30  ;;  %479 = vmatmul.msk.f32.vlgmr.msra.gmra.mxu2 %vm313_vm0, %v297_v11  ;;  %332 = vmatpush.msra.mxu0 %v298_v13 }
  0x23   :  { %s103_s1 = sadd.s32 %s447_s29, %s100_s28  ;;  %s125_s8 = sshra.s32 %s707_s5, 3  ;;  %352 = vmatpush.msra.mxu1 %v299_v15  ;;  %477 = vmatmul.msk.f32.vlgmr.msra.gmra.mxu0 %vm313_vm0, %v297_v11 }
  0x24   :  { %s112_s9 = sadd.s32 %s448_s7, %s109_s0  ;;  %s104_s10 = scalar_lea.vmem [#allocation11], %s103_s1  ;;  %478 = vmatmul.msk.f32.vlgmr.msra.gmra.mxu1 %vm313_vm0, %v297_v11 }
  0x25   :  { %v105_v14 = vld [vmem:[%s104_s10] ss:$8 sm:$0x7]  ;;  %s128_s11 = sand.u32 7, %s707_s5  ;;  %s113_s12 = scalar_lea.vmem [#allocation12], %s112_s9 }
  0x26   :  { %v114_v16 = vld [vmem:[%s113_s12] ss:$8 sm:$0x7]  ;;  %s451_s13 = smul.u32 24, %s125_s8  ;;  %s134_s14 = sshra.s32 %s709_s24, 3 }
  0x27   :  { %v115_v17 = vadd.f32 %v114_v16, %v105_v14  ;;  %s137_s15 = sand.u32 7, %s709_s24  ;;  %s452_s16 = smul.u32 24, %s134_s14 }
  0x28   :  { %s131_s17 = sadd.s32 %s451_s13, %s128_s11  ;;  %s150_s3 = sshra.s32 %s711_s25, 3 }
  0x29   :  { %120 = vst.msk [vmem:[#allocation2] ss:$8 sm:$0x7] %vm718_vm1, %v115_v17  ;;  %s140_s18 = sadd.s32 %s452_s16, %s137_s15  ;;  %s132_s19 = scalar_lea.vmem [#allocation11], %s131_s17 }
  0x2a   :  { %v133_v18 = vld [vmem:[%s132_s19] ss:$8 sm:$0x7]  ;;  %s153_s20 = sand.u32 7, %s711_s25  ;;  %s141_s21 = scalar_lea.vmem [#allocation12], %s140_s18 }
  0x2b   :  { %v142_v19 = vld [vmem:[%s141_s21] ss:$8 sm:$0x7]  ;;  %s455_s2 = smul.u32 24, %s150_s3  ;;  %s159_s22 = sshra.s32 %s713_s26, 3 }
  0x2c   :  { %v143_v20 = vadd.f32 %v142_v19, %v133_v18  ;;  %s162_s4 = sand.u32 7, %s713_s26  ;;  %s456_s23 = smul.u32 24, %s159_s22 }
  0x2d   :  { %s156_s5 = sadd.s32 %s455_s2, %s153_s20  ;;  %s457_s24 = sld [smem:[#allocation4 + $0x3]] }
  0x2e   :  { %145 = vst.msk [vmem:[#allocation2 + $0x1] ss:$8 sm:$0x7] %vm718_vm1, %v143_v20  ;;  %s165_s27 = sadd.s32 %s456_s23, %s162_s4  ;;  %s157_s28 = scalar_lea.vmem [#allocation11], %s156_s5 }
  0x2f   :  { %v158_v21 = vld [vmem:[%s157_s28] ss:$8 sm:$0x7]  ;;  %s458_s29 = sld [smem:[#allocation5 + $0x3]]  ;;  %s166_s30 = scalar_lea.vmem [#allocation12], %s165_s27 }
  0x30   :  { %v167_v22 = vld [vmem:[%s166_s30] ss:$8 sm:$0x7]  ;;  %s461_s0 = sld [smem:[#allocation4 + $0x4]] }
  0x31   :  { %v168_v23 = vadd.f32 %v167_v22, %v158_v21  ;;  %s736_s25 = sld [smem:[#allocation5 + $0x4]] }
  0x32   :  { %s738_s7 = sld [smem:[#allocation4 + $0x5]] }
  0x33   :  { %170 = vst.msk [vmem:[#allocation2 + $0x2] ss:$8 sm:$0x7] %vm718_vm1, %v168_v23  ;;  %s175_s26 = sshra.s32 %s457_s24, 3  ;;  %s178_s1 = sand.u32 7, %s457_s24 }
  0x34   :  { %s459_s8 = smul.u32 24, %s175_s26  ;;  %s742_s9 = sld [smem:[#allocation5 + $0x5]] }
  0x35   :  { %s184_s10 = sshra.s32 %s458_s29, 3  ;;  %s187_s11 = sand.u32 7, %s458_s29 }
  0x36   :  { %s181_s12 = sadd.s32 %s459_s8, %s178_s1  ;;  %s460_s13 = smul.u32 24, %s184_s10 }
  0x37   :  { %s200_s14 = sshra.s32 %s461_s0, 3  ;;  %s182_s15 = scalar_lea.vmem [#allocation11], %s181_s12 }
  0x38   :  { %v183_v24 = vld [vmem:[%s182_s15] ss:$8 sm:$0x7]  ;;  %s190_s16 = sadd.s32 %s460_s13, %s187_s11  ;;  %s203_s17 = sand.u32 7, %s461_s0 }
  0x39   :  { %s463_s3 = smul.u32 24, %s200_s14  ;;  %s191_s18 = scalar_lea.vmem [#allocation12], %s190_s16 }
  0x3a   :  { %v192_v25 = vld [vmem:[%s191_s18] ss:$8 sm:$0x7]  ;;  %s209_s19 = sshra.s32 %s736_s25, 3  ;;  %s212_s20 = sand.u32 7, %s736_s25 }
  0x3b   :  { %v193_v26 = vadd.f32 %v192_v25, %v183_v24  ;;  %s206_s21 = sadd.s32 %s463_s3, %s203_s17  ;;  %s464_s2 = smul.u32 24, %s209_s19 }
  0x3c   :  { %s225_s22 = sshra.s32 %s738_s7, 3  ;;  %s207_s4 = scalar_lea.vmem [#allocation11], %s206_s21 }
  0x3d   :  { %195 = vst.msk [vmem:[#allocation2 + $0x3] ss:$8 sm:$0x7] %vm718_vm1, %v193_v26  ;;  %v208_v27 = vld [vmem:[%s207_s4] ss:$8 sm:$0x7]  ;;  %s215_s23 = sadd.s32 %s464_s2, %s212_s20 }
  0x3e   :  { %s228_s5 = sand.u32 7, %s738_s7  ;;  %s216_s24 = scalar_lea.vmem [#allocation12], %s215_s23 }
  0x3f   :  { %v217_v28 = vld [vmem:[%s216_s24] ss:$8 sm:$0x7]  ;;  %s467_s27 = smul.u32 24, %s225_s22  ;;  %s234_s28 = sshra.s32 %s742_s9, 3 }
  0x40   :  { %v218_v29 = vadd.f32 %v217_v28, %v208_v27  ;;  %s237_s29 = sand.u32 7, %s742_s9  ;;  %s468_s30 = smul.u32 24, %s234_s28 }
  0x41   :  { %s231_s0 = sadd.s32 %s467_s27, %s228_s5  ;;  %s469_s25 = sld [smem:[#allocation4 + $0x6]] }
  0x42   :  { %220 = vst.msk [vmem:[#allocation2 + $0x4] ss:$8 sm:$0x7] %vm718_vm1, %v218_v29  ;;  %s240_s26 = sadd.s32 %s468_s30, %s237_s29  ;;  %s232_s1 = scalar_lea.vmem [#allocation11], %s231_s0 }
  0x43   :  { %v233_v30 = vld [vmem:[%s232_s1] ss:$8 sm:$0x7]  ;;  %s470_s8 = sld [smem:[#allocation5 + $0x6]]  ;;  %s241_s10 = scalar_lea.vmem [#allocation12], %s240_s26 }
  0x44   :  { %v242_v31 = vld [vmem:[%s241_s10] ss:$8 sm:$0x7]  ;;  %s473_s11 = sld [smem:[#allocation4 + $0x7]]  ;;  %s651_s29 = smov [#allocation14]  }
  0x45   :  { %v243_v32 = vadd.f32 %v242_v31, %v233_v30  ;;  %s474_s7 = sld [smem:[#allocation5 + $0x7]]  ;;  %s385_s30 = sshll.u32 %s651_s29, 4  ;;  %s386_s30 = int_to_ptr.vmem [resolvable:$true] %s385_s30 }
  0x46   :  { %s387_s26 = sshll.u32 %s768_s6, 4  ;;  %s388_s26 = int_to_ptr.hbm [resolvable:$true] %s387_s26 }
  0x47   :  { %245 = vst.msk [vmem:[#allocation2 + $0x5] ss:$8 sm:$0x7] %vm718_vm1, %v243_v32  ;;  %s250_s12 = sshra.s32 %s469_s25, 3  ;;  %s253_s9 = sand.u32 7, %s469_s25 }
  0x48   :  { %s471_s13 = smul.u32 24, %s250_s12 }
  0x49   :  { %s259_s14 = sshra.s32 %s470_s8, 3  ;;  %s262_s15 = sand.u32 7, %s470_s8 }
  0x4a   :  { %s256_s16 = sadd.s32 %s471_s13, %s253_s9  ;;  %s472_s17 = smul.u32 24, %s259_s14 }
  0x4b   :  { %s275_s3 = sshra.s32 %s473_s11, 3  ;;  %s257_s18 = scalar_lea.vmem [#allocation11], %s256_s16 }
  0x4c   :  { %v258_v33 = vld [vmem:[%s257_s18] ss:$8 sm:$0x7]  ;;  %s265_s19 = sadd.s32 %s472_s17, %s262_s15  ;;  %s278_s20 = sand.u32 7, %s473_s11 }
  0x4d   :  { %s475_s21 = smul.u32 24, %s275_s3  ;;  %s266_s2 = scalar_lea.vmem [#allocation12], %s265_s19 }
  0x4e   :  { %v267_v34 = vld [vmem:[%s266_s2] ss:$8 sm:$0x7]  ;;  %s284_s22 = sshra.s32 %s474_s7, 3  ;;  %s287_s4 = sand.u32 7, %s474_s7 }
  0x4f   :  { %v268_v35 = vadd.f32 %v267_v34, %v258_v33  ;;  %s281_s23 = sadd.s32 %s475_s21, %s278_s20  ;;  %s476_s5 = smul.u32 24, %s284_s22 }
  0x50   :  { %s282_s24 = scalar_lea.vmem [#allocation11], %s281_s23 }
  0x51   :  { %270 = vst.msk [vmem:[#allocation2 + $0x6] ss:$8 sm:$0x7] %vm718_vm1, %v268_v35  ;;  %v283_v36 = vld [vmem:[%s282_s24] ss:$8 sm:$0x7]  ;;  %s290_s27 = sadd.s32 %s476_s5, %s287_s4 }
  0x52   :  { %s291_s28 = scalar_lea.vmem [#allocation12], %s290_s27 }
  0x53   :  { %v292_v37 = vld [vmem:[%s291_s28] ss:$8 sm:$0x7] }
  0x54   :  { %v293_v38 = vadd.f32 %v292_v37, %v283_v36 }
  0x56   :  { %295 = vst.msk [vmem:[#allocation2 + $0x7] ss:$8 sm:$0x7] %vm718_vm1, %v293_v38 }
  0x5d   :  { %v310_v39 = vld [vmem:[#allocation2] sm:$0xff]  ;;  %v311_v40 = vld [vmem:[#allocation2 + $0x8] sm:$0xff]  ;;  %v312_v45 = vld [vmem:[#allocation2 + $0x10] sm:$0xff] }
  0xa0   :  { %v334_v41 = vpop.f32.mrf.mxu0 }
  0xa1   :  { %v335_v42 = vadd.f32 %v334_v41, %v310_v39  ;;  %v354_v43 = vpop.f32.mrf.mxu1 }
  0xa2   :  { %v355_v44 = vadd.f32 %v354_v43, %v311_v40 }
  0xa3   :  { %377 = vst [vmem:[#allocation14] sm:$0xff] %v335_v42 }
  0xa4   :  { %378 = vst [vmem:[#allocation14 + $0x8] sm:$0xff] %v355_v44 }
  0xa5   :  { %v374_v46 = vpop.f32.mrf.mxu2 }
  0xa6   :  { %v375_v47 = vadd.f32 %v374_v46, %v312_v45 }
  0xa8   :  { %379 = vst [vmem:[#allocation14 + $0x10] sm:$0xff] %v375_v47 }
  0xa9   :  { %390 = dma.vmem_to_hbm [thread:$0]  %s386_s30, 384, %s388_s26, [#allocation8]  }
  0xaa   :  { %641 = dma.done.wait [#allocation8], 384  }
  0xab   :  { %642 = vsyncadd [#allocation8], 4294966912 }
  0xac   :  { %395 = vsyncpa [#allocation7], 1 }
  0xad   :  { %396 = vsyncpa [#allocation10], 1 }
  0xae   :  { %397 = vsyncpa [#allocation13], 1 }
  0xaf   :  { %398 = vsyncpa [#allocation8], 1 }

</bundles_post_ra>
